<compile_context>
chip_gen: v7x
topology: tpu7x:2x2x1
jax: 0.10.0
libtpu: 0.0.40
codegen_flags: <defaults>
</compile_context>

<pallas_src>
import jax
import jax.numpy as jnp
from jax.experimental import pallas as pl
from jax.experimental.pallas import tpu as pltpu

_HALO = 8  # sublane-aligned halo block; requires K - 1 <= 8


def _round_up(v, m):
    return ((v + m - 1) // m) * m


def _gated_cnn_kernel(x_ref, halo_ref, w_ref, o_ref):
    # x_ref   : (1, TS, H)    bf16 current sequence tile (globally left-padded)
    # halo_ref: (1, 8, H)     bf16 first rows of the next tile (right halo)
    # w_ref   : (K*H, 2*H)    bf16 fused im2col weights [W_cnn | W_gate]
    # o_ref   : (1, TS, H)    output tile
    TS = x_ref.shape[1]
    H = x_ref.shape[2]
    K = w_ref.shape[0] // H

    body = x_ref[0]                                   # (TS, H)
    if K > 1:
        win = jnp.concatenate([body, halo_ref[0, :K - 1]], axis=0)  # (TS+K-1, H)
    else:
        win = body

    # im2col: concatenate the K shifted views along lanes -> one wide-contraction
    # MXU matmul instead of K narrow ones.  (The shifted sublane slices still
    # cost relayout copies; acceptable vs. K separate matmuls at small H.)
    cols = jnp.concatenate([win[k:k + TS, :] for k in range(K)], axis=-1)  # (TS, K*H)

    acc = jnp.dot(cols, w_ref[...], preferred_element_type=jnp.float32)    # (TS, 2H)

    a = acc[:, :H]                      # conv branch (f32)
    g = jax.nn.sigmoid(acc[:, H:])      # gate branch (f32, EUP)
    o_ref[0] = (a * g).astype(o_ref.dtype)


def gated_cnn(x, w_cnn, w_gate, *, seq_tile=256):
    """GatedCNN forward.

    x      : (B, S, H) float32
    w_cnn  : (H_out, H_in, K) PyTorch Conv1d weight layout
    w_gate : (H_out, H_in, K)
    returns: (B, S, H) float32
    """
    B, S, H = x.shape
    H_out, H_in, K = w_cnn.shape
    assert w_gate.shape == (H_out, H_in, K)
    assert H_in == H and H_out == H
    assert K % 2 == 1, "GatedCNN 'same' padding requires an odd kernel_size"
    assert K - 1 <= _HALO, "kernel_size too large for the 8-row halo block"
    pad = (K - 1) // 2

    # Sequence tile: multiple of 8 sublanes, capped so the working set stays
    # comfortably inside every generation's VMEM.
    TS = _round_up(max(8, min(seq_tile, _round_up(S, 8))), 8)
    nS = pl.cdiv(S, TS)
    Sp = nS * TS + _HALO                     # padded sequence length

    # One pass over x: zero-pad the seq axis AND cast to bf16 for the MXU.
    xp = jnp.pad(x.astype(jnp.bfloat16), ((0, 0), (pad, Sp - S - pad), (0, 0)))

    # Fused im2col weights: W2[k*H + c_in, c_out] = w[c_out, c_in, k],
    # conv and gate concatenated along the output-channel (lane) axis.
    w_fused = jnp.concatenate(
        [jnp.transpose(w_cnn, (2, 1, 0)).reshape(K * H, H),
         jnp.transpose(w_gate, (2, 1, 0)).reshape(K * H, H)],
        axis=-1).astype(jnp.bfloat16)

    # Per-step VMEM footprint estimate (double-buffered ins/outs + intermediates).
    est = (2 * (TS + _HALO) * H * 2            # x body + halo tiles, bf16, x2 bufs
           + 2 * (K * H) * (2 * H) * 2         # fused weights, bf16, x2 bufs
           + 2 * TS * H * 4                    # output tile, f32, x2 bufs
           + TS * K * H * 2 + TS * 2 * H * 4)  # im2col + f32 accumulator
    vmem_limit = int(min(64 * 2**20, max(32 * 2**20, 2 * est)))

    return pl.pallas_call(
        _gated_cnn_kernel,
        out_shape=jax.ShapeDtypeStruct((B, S, H), x.dtype),
        grid=(B, nS),
        in_specs=[
            # Current sequence tile (rows [i*TS, (i+1)*TS) of the padded seq).
            pl.BlockSpec((1, TS, H), lambda b, i: (b, i, 0)),
            # Right halo: first 8 rows of the next tile (always in bounds).
            pl.BlockSpec((1, _HALO, H), lambda b, i: (b, (i + 1) * (TS // _HALO), 0)),
            # Fused weights, grid-invariant.
            pl.BlockSpec((K * H, 2 * H), lambda b, i: (0, 0)),
        ],
        out_specs=pl.BlockSpec((1, TS, H), lambda b, i: (b, i, 0)),
        compiler_params=pltpu.CompilerParams(
            dimension_semantics=("parallel", "parallel"),
            vmem_limit_bytes=vmem_limit),
    )(xp, xp, w_fused)


def gated_cnn_reference(x, w_cnn, w_gate):
    """Pure-JAX reference matching the PyTorch module (cross-correlation, zero
    pad), with operands rounded to bf16 to mirror the kernel's MXU precision."""
    K = w_cnn.shape[-1]
    pad = (K - 1) // 2
    xb = x.astype(jnp.bfloat16).astype(jnp.float32)

    def conv1d(inp, w):
        wb = jnp.transpose(w, (2, 1, 0)).astype(jnp.bfloat16).astype(jnp.float32)
        return jax.lax.conv_general_dilated(
            inp, wb,                                   # (K, I, O)
            window_strides=(1,), padding=((pad, pad),),
            dimension_numbers=("NWC", "WIO", "NWC"),
            precision=jax.lax.Precision.HIGHEST)

    a = conv1d(xb, w_cnn)
    b = conv1d(xb, w_gate)
    return a * jax.nn.sigmoid(b)


if __name__ == "__main__":
    key = jax.random.PRNGKey(0)
    kx, ka, kb = jax.random.split(key, 3)

    B, S, H, K = 2, 16, 32, 3          # batch, seq, hidden_size, kernel_size

    x = jax.random.normal(kx, (B, S, H), jnp.float32)
    scale = 1.0 / (H * K) ** 0.5       # ~ PyTorch Conv1d default init scale
    w_cnn = scale * jax.random.normal(ka, (H, H, K), jnp.float32)
    w_gate = scale * jax.random.normal(kb, (H, H, K), jnp.float32)

    out = jax.block_until_ready(gated_cnn(x, w_cnn, w_gate))
    assert out.shape == (B, S, H) and out.dtype == jnp.float32

    ref = gated_cnn_reference(x, w_cnn, w_gate)
    max_err = float(jnp.max(jnp.abs(out - ref)))
    assert jnp.allclose(out, ref, rtol=2e-3, atol=2e-3), max_err

    print("KERNEL_OK")
</pallas_src>

<mosaic_0001>
module attributes {stable_mosaic.version = 11 : i64} {
  func.func @_gated_cnn_kernel(%arg0: i32, %arg1: i32, %arg2: memref<1x16x32xbf16, #tpu.memory_space<vmem>>, %arg3: memref<1x8x32xbf16, #tpu.memory_space<vmem>>, %arg4: memref<96x64xbf16, #tpu.memory_space<vmem>>, %arg5: memref<1x16x32xf32, #tpu.memory_space<vmem>>) attributes {dimension_semantics = [#tpu.dimension_semantics<parallel>, #tpu.dimension_semantics<parallel>], iteration_bounds = array<i64: 2, 1>, scalar_prefetch = 0 : i64, scratch_operands = 0 : i64, tpu.core_type = #tpu.core_type<tc>, window_params = [{transform_indices = @transform_0, window_bounds = array<i64: 1, 16, 32>}, {transform_indices = @transform_1, window_bounds = array<i64: 1, 8, 32>}, {pipeline_mode = #tpu.pipeline_mode<synchronous>, transform_indices = @transform_2, window_bounds = array<i64: 96, 64>}, {transform_indices = @transform_3, window_bounds = array<i64: 1, 16, 32>}]} {
    %c0 = arith.constant 0 : index
    %c0_0 = arith.constant 0 : index
    %c0_1 = arith.constant 0 : index
    %0 = vector.load %arg2[%c0, %c0_0, %c0_1] : memref<1x16x32xbf16, #tpu.memory_space<vmem>>, vector<1x16x32xbf16>
    %1 = vector.shape_cast %0 : vector<1x16x32xbf16> to vector<16x32xbf16>
    %c0_2 = arith.constant 0 : index
    %c0_3 = arith.constant 0 : index
    %c0_4 = arith.constant 0 : index
    %2 = vector.load %arg3[%c0_2, %c0_3, %c0_4] : memref<1x8x32xbf16, #tpu.memory_space<vmem>>, vector<1x2x32xbf16>
    %3 = vector.shape_cast %2 : vector<1x2x32xbf16> to vector<2x32xbf16>
    %4 = tpu.concatenate %1, %3 in 0 : vector<16x32xbf16>, vector<2x32xbf16> -> vector<18x32xbf16>
    %5 = vector.extract_strided_slice %4 {offsets = [0, 0], sizes = [16, 32], strides = [1, 1]} : vector<18x32xbf16> to vector<16x32xbf16>
    %6 = vector.extract_strided_slice %4 {offsets = [1, 0], sizes = [16, 32], strides = [1, 1]} : vector<18x32xbf16> to vector<16x32xbf16>
    %7 = vector.extract_strided_slice %4 {offsets = [2, 0], sizes = [16, 32], strides = [1, 1]} : vector<18x32xbf16> to vector<16x32xbf16>
    %8 = tpu.concatenate %5, %6, %7 in 1 : vector<16x32xbf16>, vector<16x32xbf16>, vector<16x32xbf16> -> vector<16x96xbf16>
    %c0_5 = arith.constant 0 : index
    %c0_6 = arith.constant 0 : index
    %9 = vector.load %arg4[%c0_5, %c0_6] : memref<96x64xbf16, #tpu.memory_space<vmem>>, vector<96x64xbf16>
    %cst = arith.constant dense<0.000000e+00> : vector<16x64xf32>
    %10 = tpu.matmul %8, %9, %cst {dimension_numbers = #tpu.dot_dimension_numbers<[1], [0], [0], [1], [0, 0, 1, 1], [], []>} : vector<16x96xbf16>, vector<96x64xbf16>, vector<16x64xf32> -> vector<16x64xf32>
    %11 = vector.extract_strided_slice %10 {offsets = [0, 0], sizes = [16, 32], strides = [1, 1]} : vector<16x64xf32> to vector<16x32xf32>
    %12 = vector.extract_strided_slice %10 {offsets = [0, 32], sizes = [16, 32], strides = [1, 1]} : vector<16x64xf32> to vector<16x32xf32>
    %13 = arith.negf %12 : vector<16x32xf32>
    %14 = math.exp %13 : vector<16x32xf32>
    %cst_7 = arith.constant 1.000000e+00 : f32
    %15 = vector.broadcast %cst_7 : f32 to vector<16x32xf32>
    %16 = arith.addf %15, %14 : vector<16x32xf32>
    %17 = arith.divf %15, %16 : vector<16x32xf32>
    %18 = arith.mulf %11, %17 : vector<16x32xf32>
    %c0_8 = arith.constant 0 : index
    %c0_9 = arith.constant 0 : index
    %c0_10 = arith.constant 0 : index
    %19 = vector.load %arg5[%c0_8, %c0_9, %c0_10] : memref<1x16x32xf32, #tpu.memory_space<vmem>>, vector<1x16x32xf32>
    %20 = vector.shape_cast %19 : vector<1x16x32xf32> to vector<16x32xf32>
    %21 = vector.shape_cast %18 : vector<16x32xf32> to vector<1x16x32xf32>
    tpu.vector_store %arg5[%c0_8, %c0_9, %c0_10], %21 {strides = array<i32>} : memref<1x16x32xf32, #tpu.memory_space<vmem>>, vector<1x16x32xf32>,
    return
  }
  func.func @transform_0(%arg0: i32, %arg1: i32) -> (i32, i32, i32) {
    %c0_i32 = arith.constant 0 : i32
    %c0_i32_0 = arith.constant 0 : i32
    return %arg0, %arg1, %c0_i32 : i32, i32, i32
  }
  func.func @transform_1(%arg0: i32, %arg1: i32) -> (i32, i32, i32) {
    %c1_i32 = arith.constant 1 : i32
    %0 = arith.addi %arg1, %c1_i32 : i32
    %c2_i32 = arith.constant 2 : i32
    %1 = arith.muli %0, %c2_i32 : i32
    %c0_i32 = arith.constant 0 : i32
    %c0_i32_0 = arith.constant 0 : i32
    return %arg0, %1, %c0_i32 : i32, i32, i32
  }
  func.func @transform_2(%arg0: i32, %arg1: i32) -> (i32, i32) {
    %c0_i32 = arith.constant 0 : i32
    %c0_i32_0 = arith.constant 0 : i32
    %c0_i32_1 = arith.constant 0 : i32
    return %c0_i32, %c0_i32_0 : i32, i32
  }
  func.func @transform_3(%arg0: i32, %arg1: i32) -> (i32, i32, i32) {
    %c0_i32 = arith.constant 0 : i32
    %c0_i32_0 = arith.constant 0 : i32
    return %arg0, %arg1, %c0_i32 : i32, i32, i32
  }
}

</mosaic_0001>

<bundles_post_ra>
// kernel: tpu_custom_call.1
= control target key start
LH: loop header
LB: loop body
LE: loop exit
PB: predicated region body
PF: predicated region fallthrough
CT: control target
= control target key end

     0   :  { %8 = vsyncpa [#allocation3], 0  ;;  %s907_s0 = inlined_call_operand.vmem [shape: bf16[2,24,32], index: 0, kind: input, shape index: {}]   ;;  %s908_s1 = inlined_call_operand.vmem [shape: bf16[2,24,32], index: 1, kind: input, shape index: {}]   ;;  %s909_s2 = inlined_call_operand.vmem [shape: bf16[96,64], index: 2, kind: input, shape index: {}]   ;;  %s910_s3 = inlined_call_operand.hbm [shape: f32[2,16,32], index: 3, kind: output, shape index: {}]  }
   0x1   :  { %10 = vsyncpa [#allocation3 + $0x1], 0  ;;  %s768_s12 = smov 0   ;;  %s770_s13 = smov 0  }
   0x2   :  { %s772_s14 = smov 0   ;;  %s774_s15 = smov 0  }
   0x3   :  { %s776_s16 = smov 0   ;;  %s778_s17 = smov 0  }
   0x4 LB: > { %s531_s18 = sadd.s32 4294967295, %s738_s17   ;;  %s532_s19 = sadd.s32 4294967294, %s738_s17   ;;  %s738_s17 = sphi %s778_s17, %s16_s17   ;;  %s734_s16 = sphi %s776_s16, %s917_s16   ;;  %s730_s15 = sphi %s774_s15, %s916_s15   ;;  %s726_s14 = sphi %s772_s14, %s915_s14   ;;  %s722_s13 = sphi %s770_s13, %s914_s13   ;;  %s718_s12 = sphi %s768_s12, %s913_s12  }
   0x5   : > { %s28_s20 = sadd.s32 1, %s734_s16  ;;  %s118_s21 = sadd.s32 1, %s726_s14 }
   0x6   : > { %p30_p0 = scmp.ge.s32.totalorder %s28_s20, 2  ;;  %p128_p1 = scmp.ne.s32.totalorder %s726_s14, %s722_s13 }
   0x7   : > { %p129_p2 = scmp.eq.s32.totalorder %s531_s18, 1  ;;  %p134_p3 = scmp.ne.s32.totalorder %s722_s13, %s718_s12 }
   0x8   : > { %s919_s20 = smov (%p30_p0, %s28_s20), 0  ;;  %p135_p5 = scmp.eq.s32.totalorder %s532_s19, 1 }
   0x9   : > { %p808_p4 = por %p129_p2, %p128_p1  ;;  %s113_s23 = ssub.s32 %s734_s16, %s919_s20 }
   0xa   : > { %p535_p6 = scmp.ge.s32.totalorder %s738_s17, 1  ;;  %p116_p7 = scmp.eq.s32.totalorder %s113_s23, 0 }
   0xb   : > { %p815_p8 = por %p135_p5, %p134_p3  ;;  %p192_p9 = scmp.lt.s32.totalorder %s738_s17, 3 }
   0xc   : > { %s821_s25 = scalar_select %p116_p7, %s726_s14, %s118_s21  }
   0xd   : > { %p193_p10 = pnand %p535_p6, %p192_p9 }
   0xe   : > { %p239_p11 = scmp.lt.s32.totalorder (!%p193_p10), %s730_s15, 1  ;;  %v740_v0 = vmov (!%p193_p10), 0.0   ;;  %v646_v1 = vld [vmem:[%s909_s2] sm:$0xff] (!%p193_p10)   ;;  %v647_v2 = vld [vmem:[%s909_s2 + $0x8] sm:$0xff] (!%p193_p10)   ;;  %v648_v3 = vld [vmem:[%s909_s2 + $0x10] sm:$0xff] (!%p193_p10)   ;;  %vm741_vm0 = vmmov (!%p193_p10), 0  }
   0xf   : > { %196 = sbr.rel (%p193_p10) target bundleno = 529 (0x211), region = 32  ;;  %564 = vmatprep.subr.bf16.mxu0 (!%p193_p10), %v740_v0  ;;  %576 = vmatprep.mubr.msk.bf16.mxu0 (!%p193_p10), %vm741_vm0, %v740_v0  ;;  %v649_v11 = vld [vmem:[%s909_s2 + $0x18] sm:$0xff] (!%p193_p10)   ;;  %vm274_vm1 = vsmask.f32 (!%p193_p10), 7424  ;;  %vm290_vm2 = vcmask (!%p193_p10), 1046528   ;;  %v650_v16 = vld [vmem:[%s909_s2 + $0x20] sm:$0xff] (!%p193_p10)  }
  0x10   : > { %565 = vmatpush3.bf16.msra.mxu0 (!%p193_p10), %v646_v1  ;;  %v651_v18 = vld [vmem:[%s909_s2 + $0x28] sm:$0xff] (!%p193_p10)   ;;  %vm296_vm3 = vcmask (!%p193_p10), 261120   ;;  %vm299_vm4 = vcmask (!%p193_p10), 523264   ;;  %vm350_vm5 = vcmask (!%p193_p10), 785408   ;;  %s744_s5 = smov (!%p193_p10), 96   ;;  %s231_s6 = sand.u32 (!%p193_p10), 1, %s722_s13  }
  0x11   : > { %566 = vmatprep.subr.bf16.mxu0 (!%p193_p10), %v740_v0  ;;  %s556_s10 = sshll.u32 (!%p193_p10), %s730_s15, 8  ;;  %s861_s21 = scalar_lea.sflag (!%p193_p10), [#allocation3], %s231_s6 }
  0x14   : > { %567 = vmatpush3.bf16.msra.mxu0 (!%p193_p10), %v647_v2 }
  0x15   : > { %568 = vmatprep.subr.bf16.mxu0 (!%p193_p10), %v740_v0 }
  0x16   : > { %s240_s28 = scalar_select %p239_p11, %s730_s15, 1 }
  0x17   : > { %s745_s15 = smov [#allocation2]  }
  0x18   : > { %s580_s4 = smul.u32 12, %s240_s28  ;;  %569 = vmatpush3.bf16.msra.mxu0 %v648_v3  ;;  %s742_s28 = smov 32  }
  0x19   : > { %570 = vmatprep.subr.bf16.mxu0 %v740_v0  ;;  %s664_s26 = sshll.u32 %s745_s15, 4  ;;  %s665_s26 = int_to_ptr.vmem [resolvable:$false] %s664_s26 }
  0x1a   : > { %s246_s7 = scalar_lea.vmem %s907_s0, %s580_s4  ;;  %s555_s8 = sadd.s32 8, %s580_s4 }
  0x1b   : > { %s261_s19 = scalar_lea.vmem %s908_s1, %s555_s8  ;;  %v645_v4 = vld [vmem:[%s246_s7] sm:$0xff]   ;;  %s743_s4 = smov 64  }
  0x1c   : > { %v268_v5 = vld [vmem:[%s261_s19] sm:$0x1]  ;;  %v276_v6 = vshrl.u32 %v645_v4, 16  ;;  %v278_v7 = vshll.u32 %v645_v4, 16  ;;  %v291_v13 = vrot.slane %v645_v4, 1  ;;  %571 = vmatpush3.bf16.msra.mxu0 %v649_v11  ;;  %s536_s7 = sshll.u32 %s231_s6, 4  ;;  %s858_s19 = scalar_lea.hbm %s910_s3, %s556_s10 }
  0x1d   : > { %v283_v8 = vshll.u32 %v268_v5, 16  ;;  %v292_v14 = vrot.slane %v268_v5, 1  ;;  %572 = vmatprep.subr.bf16.mxu0 %v740_v0  ;;  %s233_s8 = scalar_lea.vmem [#allocation2], %s536_s7  ;;  %s666_s27 = scalar_lea.vmem %s665_s26, 512 }
  0x1e   : > { %v280_v9 = vrot.slane %v278_v7, 1  ;;  %s434_s9 = sshll.u32 %s233_s8, 4  ;;  %s853_s9 = int_to_ptr.vmem [resolvable:$true] %s434_s9 }
  0x1f   : > { %v285_v10 = vrot.slane %v283_v8, 1  ;;  %v293_v17 = vsel %vm290_vm2, %v291_v13, %v292_v14  ;;  %s660_s23 = scalar_lea.vmem %s853_s9, 256  ;;  %p667_p1 = scmp.lt.s32.totalorder %s853_s9, %s665_s26 }
  0x20   : > { %v281_v12 = vor.u32 %v280_v9, %v276_v6  ;;  %573 = vmatpush3.bf16.msra.mxu0 %v650_v16  ;;  %p661_p12 = scmp.ne.s32.totalorder %s853_s9, %s660_s23  ;;  %p668_p2 = scmp.lt.s32.totalorder %s666_s27, %s660_s23 }
  0x21   : > { %574 = vmatprep.subr.bf16.mxu0 %v740_v0 }
  0x22   : > { %v286_v15 = vsel %vm274_vm1, %v281_v12, %v285_v10  ;;  %p662_p13 = pnand %p661_p12, %p808_p4  ;;  %p669_p3 = por %p668_p2, %p667_p1 }
  0x23   : > { %287 = vrot.lane.b32.xlu0 %v286_v15, %s742_s28 }
  0x24   : > { %575 = vmatpush3.bf16.msra.mxu0 %v651_v18  ;;  %p663_p0 = pneg %p662_p13 }
  0x26   : > { %p670_p5 = pnand %p669_p3, %p663_p0 }
  0x27   : > { %294 = vrot.lane.b32.xlu0 %v293_v17, %s743_s4 }
  0x95   : > { %v288_v19 = vpop.permute.xlu0 %287 }
  0x96   : > { %v298_v20 = vsel %vm296_vm3, %v645_v4, %v288_v19 }
  0x99   : > { %v295_v21 = vpop.permute.xlu0 %294 }
  0x9a   : > { %v301_v22 = vsel %vm299_vm4, %v298_v20, %v295_v21 }
  0x9b   : > { %577 = vmatmul.mubr.msk.bf16.vlgmr.msra.gmra.mrb[0].mxu0 %vm350_vm5, %v301_v22 }
 0x16e   : > { %v387_v23 = vpop.f32.mrb[0].mxu0 }
 0x16f   : > { %v547_v24 = vmul.f32 -1.442695, %v387_v23  ;;  %v578_v25 = vpop.f32.mrb[1].mxu0 }
 0x170   : > { %v390_v26 = vpop.f32.mrb[2].mxu0 }
 0x171   : > { %652 = vpow2.f32 %v547_v24  ;;  %v548_v27 = vmul.f32 -1.442695, %v390_v26  ;;  %v579_v28 = vpop.f32.mrb[3].mxu0 }
 0x173   : > { %654 = vpow2.f32 %v548_v27 }
 0x17b   : > { %v653_v29 = vpop.eup %652 }
 0x17c   : > { %v400_v30 = vadd.f32 1.0, %v653_v29 }
 0x17d   : > { %v655_v31 = vpop.eup %654 }
 0x17e   : > { %656 = vrcp.f32 %v400_v30  ;;  %v401_v32 = vadd.f32 1.0, %v655_v31 }
 0x180   : > { %658 = vrcp.f32 %v401_v32 }
 0x188   : > { %v657_v33 = vpop.eup %656 }
 0x189   : > { %408 = vrot.lane.b32.xlu1 %v657_v33, %s744_s5 }
 0x18a   : > { %v659_v34 = vpop.eup %658 }
 0x18d   : > { %410 = vrot.lane.b32.xlu1 %v659_v34, %s744_s5 }
 0x1fb   : > { %v409_v35 = vpop.permute.xlu1 %408 }
 0x1fc   : > { %v414_v36 = vmul.f32 %v409_v35, %v387_v23 }
 0x1fe   : > { %416 = vst.msk [vmem:[%s233_s8] sm:$0xff] %vm296_vm3, %v414_v36 }
 0x1ff   : > { %v411_v37 = vpop.permute.xlu1 %410 }
 0x200   : > { %v415_v38 = vmul.f32 %v411_v37, %v390_v26 }
 0x202   : > { %417 = vst.msk [vmem:[%s233_s8 + $0x8] sm:$0xff] %vm296_vm3, %v415_v38 }
 0x203   : > { %673 = shalt.err (!%p670_p5)
}
 0x204   : > { %s674_s28 = scalar_lea.hbm %s858_s19, 256  ;;  %s678_s4 = scalar_lea.hbm %s910_s3, 512 }
 0x205   : > { %p675_p6 = scmp.ne.s32.totalorder %s858_s19, %s674_s28  ;;  %p679_p10 = scmp.lt.u32.totalorder %s858_s19, %s910_s3 }
 0x206   : > { %p680_p11 = scmp.lt.u32.totalorder %s678_s4, %s674_s28  ;;  %p682_p13 = scmp.lt.u32.totalorder %s674_s28, %s858_s19 }
 0x207   : > { %p676_p7 = pnand %p675_p6, %p808_p4 }
 0x208   : > { %p681_p12 = por %p680_p11, %p679_p10 }
 0x209   : > { %p677_p9 = pneg %p676_p7 }
 0x20a   : > { %p683_p0 = por %p682_p13, %p681_p12 }
 0x20c   : > { %p684_p1 = pnand %p683_p0, %p677_p9 }
 0x20e   : > { %687 = shalt.err (!%p684_p1)
}
 0x20f   : > { %s746_s7 = smov 128   ;;  %s747_s8 = smov 8  }
 0x210   : > { %582 = dma.vmem_to_hbm [thread:$0]  (%p808_p4), %s853_s9, 256, %s858_s19, %s861_s21, %s746_s7, %s746_s7, %s747_s8  }
 0x211 PF: > { %p589_p2 = scmp.ge.s32.totalorder %s738_s17, 2  ;;  %s449_s10 = sand.u32 1, %s718_s12  }
 0x212   : > { %s450_s11 = scalar_lea.sflag [#allocation3], %s449_s10 }
 0x213   : > { %p585_p3 = pnand %p589_p2, %p815_p8 }
 0x215   : > { %713 = dma.done.wait (!%p585_p3), %s450_s11, 256  }
 0x216   : > { %715 = vsyncadd (!%p585_p3), %s450_s11, 4294967040  ;;  %s16_s17 = sadd.s32 1, %s738_s17   ;;  %s913_s12 = smov %s722_s13 }
 0x217   : > { %p13_p5 = scmp.ge.s32.totalorder %s16_s17, 4   ;;  %s914_s13 = smov %s726_s14 }
 0x218   : > { %s915_s14 = smov %s821_s25  ;;  %s916_s15 = smov %s734_s16 }
 0x219   : > { %s917_s16 = smov %s919_s20  ;;  %15 = sbr.rel (!%p13_p5) target bundleno = 4 (0x4), region = 70 }
 0x220   :  { %455 = vsyncpa [#allocation3], 1 }
 0x221   :  { %457 = vsyncpa [#allocation3 + $0x1], 1 }

</bundles_post_ra>
